<compile_context>
chip_gen: v6e
topology: v6e:2x2x1
jax: 0.10.0
libtpu: 0.0.40
codegen_flags: <defaults>
</compile_context>

<pallas_src>
import jax
import jax.numpy as jnp
from jax import lax
from jax.experimental import pallas as pl
from jax.experimental.pallas import tpu as pltpu

BN_EPS = 1e-5
_VMEM_BUDGET_BYTES = 24 * 1024 * 1024  # stay under the 32 MiB scoped default (v7x-safe)


def _round_up(x, m):
    return ((x + m - 1) // m) * m


def _choose_tm(m, k_pad, c_pad):
    """Largest M tile (multiple of 8, <=1024) whose double-buffered footprint fits VMEM."""
    tm = min(1024, _round_up(m, 8))
    tm = _round_up(tm, 8)

    def footprint(t):
        # 2x (double buffer) * (bf16 patch tile + f32 y tile) + resident bf16 weights
        return 2 * (t * k_pad * 2 + t * c_pad * 4) + k_pad * c_pad * 2 + 2 * 8 * c_pad * 4

    while tm > 8 and footprint(tm) > _VMEM_BUDGET_BYTES:
        tm = max(8, _round_up(tm // 2, 8))
    return tm


# ---------------------------------------------------------------------------
# Kernels
# ---------------------------------------------------------------------------

def _matmul_stats_kernel(p_ref, w_ref, y_ref, stats_ref):
    """Pass 1: y = p @ w (bf16 in, f32 acc) + per-tile partial BN sums.

    p_ref:     (TM, K_pad)  bf16 im2col patches
    w_ref:     (K_pad, C_pad) bf16 folded conv weight (VMEM-resident across tiles)
    y_ref:     (TM, C_pad)  f32 conv output tile
    stats_ref: (1, 8, C_pad) f32; row 0 = sum(y), row 1 = sum(y*y), rows 2..7 zero
               (8 sublanes to keep the store tile-aligned and lane-dense)
    """
    y = jnp.dot(p_ref[...], w_ref[...], preferred_element_type=jnp.float32)
    y_ref[...] = y
    s = jnp.sum(y, axis=0, keepdims=True)
    q = jnp.sum(y * y, axis=0, keepdims=True)
    pad = jnp.zeros((6, y.shape[1]), jnp.float32)
    stats_ref[...] = jnp.concatenate([s, q, pad], axis=0)[None, :, :]


def _scale_shift_relu_kernel(y_ref, scale_ref, shift_ref, o_ref):
    """Pass 2: out = max(y * scale + shift, 0) — single fused FMA + ReLU, all f32."""
    o_ref[...] = jnp.maximum(y_ref[...] * scale_ref[...] + shift_ref[...], 0.0)


# ---------------------------------------------------------------------------
# Stage wrapper (conv3x3 + BN(batch stats) + ReLU)
# ---------------------------------------------------------------------------

def _im2col_padded(x_nhwc, k_pad, m_pad):
    """3x3, padding=1 im2col -> (M_pad, K_pad) bf16, zero-padded rows/cols."""
    N, H, W, C = x_nhwc.shape
    M, K = N * H * W, 9 * C
    xp = jnp.pad(x_nhwc, ((0, 0), (1, 1), (1, 1), (0, 0)))
    cols = [xp[:, dy:dy + H, dx:dx + W, :] for dy in range(3) for dx in range(3)]
    p = jnp.stack(cols, axis=3).reshape(M, K)
    p = jnp.pad(p, ((0, m_pad - M), (0, k_pad - K)))
    return p.astype(jnp.bfloat16)


def _conv_bn_relu_stage(x_nhwc, w_oihw, gamma, beta):
    N, H, W, Cin = x_nhwc.shape
    Cout = w_oihw.shape[0]
    M = N * H * W
    K = 9 * Cin
    K_pad = _round_up(K, 128)
    C_pad = _round_up(Cout, 128)
    TM = _choose_tm(M, K_pad, C_pad)
    M_pad = _round_up(M, TM)
    n_tiles = M_pad // TM

    # Host-side glue: im2col patches (bf16) and folded / padded weights.
    p = _im2col_padded(x_nhwc, K_pad, M_pad)
    wm = jnp.transpose(w_oihw, (2, 3, 1, 0)).reshape(K, Cout)
    wm = jnp.pad(wm, ((0, K_pad - K), (0, C_pad - Cout))).astype(jnp.bfloat16)
    g = jnp.pad(gamma.astype(jnp.float32), (0, C_pad - Cout))
    b = jnp.pad(beta.astype(jnp.float32), (0, C_pad - Cout))

    # ---- Pass 1: tiled matmul + per-tile partial BN statistics -------------
    y, stats = pl.pallas_call(
        _matmul_stats_kernel,
        out_shape=(
            jax.ShapeDtypeStruct((M_pad, C_pad), jnp.float32),
            jax.ShapeDtypeStruct((n_tiles, 8, C_pad), jnp.float32),
        ),
        grid=(n_tiles,),
        in_specs=[
            pl.BlockSpec((TM, K_pad), lambda i: (i, 0)),
            pl.BlockSpec((K_pad, C_pad), lambda i: (0, 0)),  # weights stay resident
        ],
        out_specs=(
            pl.BlockSpec((TM, C_pad), lambda i: (i, 0)),
            pl.BlockSpec((1, 8, C_pad), lambda i: (i, 0, 0)),
        ),
        compiler_params=pltpu.CompilerParams(dimension_semantics=("parallel",)),
    )(p, wm)

    # ---- Tiny global reduction -> BN scale / shift (zero-padded rows are zero,
    #      so we simply divide by the real M). ------------------------------
    total = jnp.sum(stats, axis=0)                      # (8, C_pad)
    mean = total[0] / float(M)
    var = jnp.maximum(total[1] / float(M) - mean * mean, 0.0)   # biased variance
    scale = g * lax.rsqrt(var + BN_EPS)
    shift = b - mean * scale
    scale = scale.reshape(1, C_pad)
    shift = shift.reshape(1, C_pad)

    # ---- Pass 2: tiled fused normalize + ReLU ------------------------------
    out = pl.pallas_call(
        _scale_shift_relu_kernel,
        out_shape=jax.ShapeDtypeStruct((M_pad, C_pad), jnp.float32),
        grid=(n_tiles,),
        in_specs=[
            pl.BlockSpec((TM, C_pad), lambda i: (i, 0)),
            pl.BlockSpec((1, C_pad), lambda i: (0, 0)),
            pl.BlockSpec((1, C_pad), lambda i: (0, 0)),
        ],
        out_specs=pl.BlockSpec((TM, C_pad), lambda i: (i, 0)),
        compiler_params=pltpu.CompilerParams(dimension_semantics=("parallel",)),
    )(y, scale, shift)

    return out[:M, :Cout].reshape(N, H, W, Cout)


@jax.jit
def vgg_block(x_nchw, params):
    """VGGBlock forward. Input/output NCHW, matching the PyTorch module."""
    x = jnp.transpose(x_nchw, (0, 2, 3, 1))  # NCHW -> NHWC (once at entry)
    # Conv bias (params["b1"]/["b2"]) is intentionally not applied: it is exactly
    # cancelled by the training-mode BatchNorm mean subtraction.
    y = _conv_bn_relu_stage(x, params["w1"], params["g1"], params["bt1"])
    y = _conv_bn_relu_stage(y, params["w2"], params["g2"], params["bt2"])
    return jnp.transpose(y, (0, 3, 1, 2))    # NHWC -> NCHW (once at exit)


def init_params(key, in_channels, middle_channels, out_channels):
    k1, k2, k3, k4 = jax.random.split(key, 4)
    return {
        # conv weights: PyTorch layout (out, in, kh, kw)
        "w1": 0.1 * jax.random.normal(k1, (middle_channels, in_channels, 3, 3), jnp.float32),
        "b1": 0.1 * jax.random.normal(k2, (middle_channels,), jnp.float32),
        "w2": 0.1 * jax.random.normal(k3, (out_channels, middle_channels, 3, 3), jnp.float32),
        "b2": 0.1 * jax.random.normal(k4, (out_channels,), jnp.float32),
        # BatchNorm2d default init: gamma=1, beta=0
        "g1": jnp.ones((middle_channels,), jnp.float32),
        "bt1": jnp.zeros((middle_channels,), jnp.float32),
        "g2": jnp.ones((out_channels,), jnp.float32),
        "bt2": jnp.zeros((out_channels,), jnp.float32),
    }


def _reference_vgg_block(x_nchw, params):
    """Pure-JAX f32 reference (NCHW, lax conv, bias INCLUDED) for correctness."""
    def conv(x, w, b):
        y = lax.conv_general_dilated(
            x, w, window_strides=(1, 1), padding="SAME",
            dimension_numbers=("NCHW", "OIHW", "NCHW"))
        return y + b[None, :, None, None]

    def bn_relu(x, g, bt):
        mean = jnp.mean(x, axis=(0, 2, 3), keepdims=True)
        var = jnp.mean((x - mean) ** 2, axis=(0, 2, 3), keepdims=True)
        y = (x - mean) * lax.rsqrt(var + BN_EPS)
        y = y * g[None, :, None, None] + bt[None, :, None, None]
        return jnp.maximum(y, 0.0)

    y = bn_relu(conv(x_nchw, params["w1"], params["b1"]), params["g1"], params["bt1"])
    y = bn_relu(conv(y, params["w2"], params["b2"]), params["g2"], params["bt2"])
    return y


if __name__ == "__main__":
    key = jax.random.PRNGKey(0)
    kx, kp = jax.random.split(key)

    N, Cin, H, W = 2, 4, 16, 16
    Cmid, Cout = 8, 8

    x = jax.random.normal(kx, (N, Cin, H, W), jnp.float32)
    params = init_params(kp, Cin, Cmid, Cout)

    out = jax.block_until_ready(vgg_block(x, params))
    ref = jax.block_until_ready(_reference_vgg_block(x, params))

    assert out.shape == (N, Cout, H, W), out.shape
    # bf16 MXU operands -> slightly looser tolerance than a pure-f32 path.
    max_err = float(jnp.max(jnp.abs(out - ref)))
    assert max_err < 5e-2, max_err

    print("KERNEL_OK")
</pallas_src>

<mosaic_0001>
module attributes {stable_mosaic.version = 11 : i64} {
  func.func @_matmul_stats_kernel(%arg0: i32, %arg1: memref<512x128xbf16, #tpu.memory_space<vmem>>, %arg2: memref<128x128xbf16, #tpu.memory_space<vmem>>, %arg3: memref<512x128xf32, #tpu.memory_space<vmem>>, %arg4: memref<1x8x128xf32, #tpu.memory_space<vmem>>) attributes {dimension_semantics = [#tpu.dimension_semantics<parallel>], iteration_bounds = array<i64: 1>, scalar_prefetch = 0 : i64, scratch_operands = 0 : i64, tpu.core_type = #tpu.core_type<tc>, window_params = [{transform_indices = @transform_0, window_bounds = array<i64: 512, 128>}, {pipeline_mode = #tpu.pipeline_mode<synchronous>, transform_indices = @transform_1, window_bounds = array<i64: 128, 128>}, {transform_indices = @transform_2, window_bounds = array<i64: 512, 128>}, {transform_indices = @transform_3, window_bounds = array<i64: 1, 8, 128>}]} {
    %c0 = arith.constant 0 : index
    %c0_0 = arith.constant 0 : index
    %0 = vector.load %arg1[%c0, %c0_0] : memref<512x128xbf16, #tpu.memory_space<vmem>>, vector<512x128xbf16>
    %c0_1 = arith.constant 0 : index
    %c0_2 = arith.constant 0 : index
    %1 = vector.load %arg2[%c0_1, %c0_2] : memref<128x128xbf16, #tpu.memory_space<vmem>>, vector<128x128xbf16>
    %cst = arith.constant dense<0.000000e+00> : vector<512x128xf32>
    %2 = tpu.matmul %0, %1, %cst {dimension_numbers = #tpu.dot_dimension_numbers<[1], [0], [0], [1], [0, 0, 1, 1], [], []>} : vector<512x128xbf16>, vector<128x128xbf16>, vector<512x128xf32> -> vector<512x128xf32>
    %c0_3 = arith.constant 0 : index
    %c0_4 = arith.constant 0 : index
    %3 = vector.load %arg3[%c0_3, %c0_4] : memref<512x128xf32, #tpu.memory_space<vmem>>, vector<512x128xf32>
    tpu.vector_store %arg3[%c0_3, %c0_4], %2 {strides = array<i32>} : memref<512x128xf32, #tpu.memory_space<vmem>>, vector<512x128xf32>,
    %cst_5 = arith.constant dense<0.000000e+00> : vector<128xf32>
    %4 = vector.multi_reduction <add>, %2, %cst_5 [0] : vector<512x128xf32> to vector<128xf32>
    %5 = vector.shape_cast %4 : vector<128xf32> to vector<1x128xf32>
    %6 = arith.mulf %2, %2 : vector<512x128xf32>
    %cst_6 = arith.constant dense<0.000000e+00> : vector<128xf32>
    %7 = vector.multi_reduction <add>, %6, %cst_6 [0] : vector<512x128xf32> to vector<128xf32>
    %8 = vector.shape_cast %7 : vector<128xf32> to vector<1x128xf32>
    %cst_7 = arith.constant 0.000000e+00 : f32
    %9 = vector.broadcast %cst_7 : f32 to vector<6x128xf32>
    %10 = tpu.concatenate %5, %8, %9 in 0 : vector<1x128xf32>, vector<1x128xf32>, vector<6x128xf32> -> vector<8x128xf32>
    %11 = vector.shape_cast %10 : vector<8x128xf32> to vector<1x8x128xf32>
    %c0_8 = arith.constant 0 : index
    %c0_9 = arith.constant 0 : index
    %c0_10 = arith.constant 0 : index
    %12 = vector.load %arg4[%c0_8, %c0_9, %c0_10] : memref<1x8x128xf32, #tpu.memory_space<vmem>>, vector<1x8x128xf32>
    tpu.vector_store %arg4[%c0_8, %c0_9, %c0_10], %11 {strides = array<i32>} : memref<1x8x128xf32, #tpu.memory_space<vmem>>, vector<1x8x128xf32>,
    return
  }
  func.func @transform_0(%arg0: i32) -> (i32, i32) {
    %c0_i32 = arith.constant 0 : i32
    %c0_i32_0 = arith.constant 0 : i32
    return %arg0, %c0_i32 : i32, i32
  }
  func.func @transform_1(%arg0: i32) -> (i32, i32) {
    %c0_i32 = arith.constant 0 : i32
    %c0_i32_0 = arith.constant 0 : i32
    %c0_i32_1 = arith.constant 0 : i32
    return %c0_i32, %c0_i32_0 : i32, i32
  }
  func.func @transform_2(%arg0: i32) -> (i32, i32) {
    %c0_i32 = arith.constant 0 : i32
    %c0_i32_0 = arith.constant 0 : i32
    return %arg0, %c0_i32 : i32, i32
  }
  func.func @transform_3(%arg0: i32) -> (i32, i32, i32) {
    %c0_i32 = arith.constant 0 : i32
    %c0_i32_0 = arith.constant 0 : i32
    %c0_i32_1 = arith.constant 0 : i32
    return %arg0, %c0_i32, %c0_i32_0 : i32, i32, i32
  }
}

module attributes {stable_mosaic.version = 11 : i64} {
  func.func @_scale_shift_relu_kernel(%arg0: i32, %arg1: memref<512x128xf32, #tpu.memory_space<vmem>>, %arg2: memref<1x128xf32, #tpu.memory_space<vmem>>, %arg3: memref<1x128xf32, #tpu.memory_space<vmem>>, %arg4: memref<512x128xf32, #tpu.memory_space<vmem>>) attributes {dimension_semantics = [#tpu.dimension_semantics<parallel>], iteration_bounds = array<i64: 1>, scalar_prefetch = 0 : i64, scratch_operands = 0 : i64, tpu.core_type = #tpu.core_type<tc>, window_params = [{transform_indices = @transform_0, window_bounds = array<i64: 512, 128>}, {pipeline_mode = #tpu.pipeline_mode<synchronous>, transform_indices = @transform_1, window_bounds = array<i64: 1, 128>}, {pipeline_mode = #tpu.pipeline_mode<synchronous>, transform_indices = @transform_2, window_bounds = array<i64: 1, 128>}, {transform_indices = @transform_3, window_bounds = array<i64: 512, 128>}]} {
    %c0 = arith.constant 0 : index
    %c0_0 = arith.constant 0 : index
    %0 = vector.load %arg1[%c0, %c0_0] : memref<512x128xf32, #tpu.memory_space<vmem>>, vector<512x128xf32>
    %c0_1 = arith.constant 0 : index
    %c0_2 = arith.constant 0 : index
    %1 = vector.load %arg2[%c0_1, %c0_2] : memref<1x128xf32, #tpu.memory_space<vmem>>, vector<1x128xf32>
    %2 = vector.broadcast %1 : vector<1x128xf32> to vector<512x128xf32>
    %3 = arith.mulf %0, %2 : vector<512x128xf32>
    %c0_3 = arith.constant 0 : index
    %c0_4 = arith.constant 0 : index
    %4 = vector.load %arg3[%c0_3, %c0_4] : memref<1x128xf32, #tpu.memory_space<vmem>>, vector<1x128xf32>
    %5 = vector.broadcast %4 : vector<1x128xf32> to vector<512x128xf32>
    %6 = arith.addf %3, %5 : vector<512x128xf32>
    %cst = arith.constant 0.000000e+00 : f32
    %7 = vector.broadcast %cst : f32 to vector<512x128xf32>
    %8 = arith.maximumf %6, %7 : vector<512x128xf32>
    %c0_5 = arith.constant 0 : index
    %c0_6 = arith.constant 0 : index
    %9 = vector.load %arg4[%c0_5, %c0_6] : memref<512x128xf32, #tpu.memory_space<vmem>>, vector<512x128xf32>
    tpu.vector_store %arg4[%c0_5, %c0_6], %8 {strides = array<i32>} : memref<512x128xf32, #tpu.memory_space<vmem>>, vector<512x128xf32>,
    return
  }
  func.func @transform_0(%arg0: i32) -> (i32, i32) {
    %c0_i32 = arith.constant 0 : i32
    %c0_i32_0 = arith.constant 0 : i32
    return %arg0, %c0_i32 : i32, i32
  }
  func.func @transform_1(%arg0: i32) -> (i32, i32) {
    %c0_i32 = arith.constant 0 : i32
    %c0_i32_0 = arith.constant 0 : i32
    %c0_i32_1 = arith.constant 0 : i32
    return %c0_i32, %c0_i32_0 : i32, i32
  }
  func.func @transform_2(%arg0: i32) -> (i32, i32) {
    %c0_i32 = arith.constant 0 : i32
    %c0_i32_0 = arith.constant 0 : i32
    %c0_i32_1 = arith.constant 0 : i32
    return %c0_i32, %c0_i32_0 : i32, i32
  }
  func.func @transform_3(%arg0: i32) -> (i32, i32) {
    %c0_i32 = arith.constant 0 : i32
    %c0_i32_0 = arith.constant 0 : i32
    return %arg0, %c0_i32 : i32, i32
  }
}

</mosaic_0001>

<bundles_post_ra>
// kernel: vgg_block.5
= control target key start
LH: loop header
LB: loop body
LE: loop exit
PB: predicated region body
PF: predicated region fallthrough
CT: control target
= control target key end

     0   :  { %s896_s0 = inlined_call_operand.vmem [shape: f32[512,128], index: 0, kind: input, shape index: {}]   ;;  %s897_s1 = inlined_call_operand.vmem [shape: f32[1,128], index: 1, kind: input, shape index: {}]   ;;  %s898_s2 = inlined_call_operand.vmem [shape: f32[1,128], index: 2, kind: input, shape index: {}]   ;;  %s899_s3 = inlined_call_operand.vmem [shape: f32[512,128], index: 3, kind: output, shape index: {}]  }
   0x1   :  { %v14_v0 = vld [vmem:[%s896_s0] sm:$0xff]  ;;  %v15_v4 = vld [vmem:[%s896_s0 + $0x8] sm:$0xff]  ;;  %v16_v5 = vld [vmem:[%s896_s0 + $0x10] sm:$0xff] }
   0x2   :  { %v380_v1 = vld [vmem:[%s897_s1] ss:$0 sm:$0xff]  ;;  %v17_v6 = vld [vmem:[%s896_s0 + $0x18] sm:$0xff]  ;;  %v19_v11 = vld [vmem:[%s896_s0 + $0x28] sm:$0xff] }
   0x3   :  { %v385_v2 = vld [vmem:[%s898_s2] ss:$0 sm:$0xff]  ;;  %v85_v3 = vmul.f32 %v380_v1, %v14_v0  ;;  %v86_v7 = vmul.f32 %v380_v1, %v15_v4  ;;  %v87_v8 = vmul.f32 %v380_v1, %v16_v5  ;;  %v88_v9 = vmul.f32 %v380_v1, %v17_v6  ;;  %v20_v12 = vld [vmem:[%s896_s0 + $0x30] sm:$0xff]  ;;  %v21_v17 = vld [vmem:[%s896_s0 + $0x38] sm:$0xff] }
   0x4   :  { %v18_v10 = vld [vmem:[%s896_s0 + $0x20] sm:$0xff]  ;;  %v90_v15 = vmul.f32 %v380_v1, %v19_v11  ;;  %v91_v16 = vmul.f32 %v380_v1, %v20_v12  ;;  %v92_v21 = vmul.f32 %v380_v1, %v21_v17  ;;  %v23_v27 = vld [vmem:[%s896_s0 + $0x48] sm:$0xff]  ;;  %v24_v28 = vld [vmem:[%s896_s0 + $0x50] sm:$0xff] }
   0x5   :  { %v156_v13 = vadd.f32 %v385_v2, %v85_v3  ;;  %v89_v14 = vmul.f32 %v380_v1, %v18_v10  ;;  %v157_v18 = vadd.f32 %v385_v2, %v86_v7  ;;  %v158_v19 = vadd.f32 %v385_v2, %v87_v8  ;;  %v22_v22 = vld [vmem:[%s896_s0 + $0x40] sm:$0xff]  ;;  %v25_v29 = vld [vmem:[%s896_s0 + $0x58] sm:$0xff]  ;;  %v27_v35 = vld [vmem:[%s896_s0 + $0x68] sm:$0xff] }
   0x6   :  { %v159_v20 = vadd.f32 %v385_v2, %v88_v9  ;;  %v161_v25 = vadd.f32 %v385_v2, %v90_v15  ;;  %v162_v26 = vadd.f32 %v385_v2, %v91_v16  ;;  %v163_v33 = vadd.f32 %v385_v2, %v92_v21  ;;  %v26_v34 = vld [vmem:[%s896_s0 + $0x60] sm:$0xff]  ;;  %v28_v36 = vld [vmem:[%s896_s0 + $0x70] sm:$0xff]  ;;  %v29_v41 = vld [vmem:[%s896_s0 + $0x78] sm:$0xff] }
   0x7   :  { %v220_v23 = vmax.f32 %v156_v13, 0.0  ;;  %v160_v24 = vadd.f32 %v385_v2, %v89_v14  ;;  %v221_v30 = vmax.f32 %v157_v18, 0.0  ;;  %v222_v31 = vmax.f32 %v158_v19, 0.0  ;;  %v30_v54 = vld [vmem:[%s896_s0 + $0x80] sm:$0xff]  ;;  %v31_v59 = vld [vmem:[%s896_s0 + $0x88] sm:$0xff]  ;;  %v32_v60 = vld [vmem:[%s896_s0 + $0x90] sm:$0xff] }
   0x8   :  { %v223_v32 = vmax.f32 %v159_v20, 0.0  ;;  %v225_v38 = vmax.f32 %v161_v25, 0.0  ;;  %v226_v39 = vmax.f32 %v162_v26, 0.0  ;;  %v93_v40 = vmul.f32 %v380_v1, %v22_v22  ;;  %v33_v61 = vld [vmem:[%s896_s0 + $0x98] sm:$0xff]  ;;  %v34_v4 = vld [vmem:[%s896_s0 + $0xa0] sm:$0xff]  ;;  %v35_v5 = vld [vmem:[%s896_s0 + $0xa8] sm:$0xff] }
   0x9   :  { %284 = vst [vmem:[%s899_s3] sm:$0xff] %v220_v23  ;;  %v224_v37 = vmax.f32 %v160_v24, 0.0  ;;  %285 = vst [vmem:[%s899_s3 + $0x8] sm:$0xff] %v221_v30  ;;  %v227_v42 = vmax.f32 %v163_v33, 0.0  ;;  %v94_v43 = vmul.f32 %v380_v1, %v23_v27  ;;  %v95_v44 = vmul.f32 %v380_v1, %v24_v28  ;;  %v36_v6 = vld [vmem:[%s896_s0 + $0xb0] sm:$0xff]  ;;  %v37_v11 = vld [vmem:[%s896_s0 + $0xb8] sm:$0xff] }
   0xa   :  { %286 = vst [vmem:[%s899_s3 + $0x10] sm:$0xff] %v222_v31  ;;  %287 = vst [vmem:[%s899_s3 + $0x18] sm:$0xff] %v223_v32  ;;  %v96_v45 = vmul.f32 %v380_v1, %v25_v29  ;;  %v164_v46 = vadd.f32 %v385_v2, %v93_v40  ;;  %v97_v47 = vmul.f32 %v380_v1, %v26_v34  ;;  %v38_v24 = vld [vmem:[%s896_s0 + $0xc0] sm:$0xff]  ;;  %v39_v29 = vld [vmem:[%s896_s0 + $0xc8] sm:$0xff] }
   0xb   :  { %288 = vst [vmem:[%s899_s3 + $0x20] sm:$0xff] %v224_v37  ;;  %289 = vst [vmem:[%s899_s3 + $0x28] sm:$0xff] %v225_v38  ;;  %v98_v48 = vmul.f32 %v380_v1, %v27_v35  ;;  %v99_v49 = vmul.f32 %v380_v1, %v28_v36  ;;  %v165_v50 = vadd.f32 %v385_v2, %v94_v43  ;;  %v40_v30 = vld [vmem:[%s896_s0 + $0xd0] sm:$0xff]  ;;  %v41_v31 = vld [vmem:[%s896_s0 + $0xd8] sm:$0xff] }
   0xc   :  { %290 = vst [vmem:[%s899_s3 + $0x30] sm:$0xff] %v226_v39  ;;  %291 = vst [vmem:[%s899_s3 + $0x38] sm:$0xff] %v227_v42  ;;  %v166_v51 = vadd.f32 %v385_v2, %v95_v44  ;;  %v167_v52 = vadd.f32 %v385_v2, %v96_v45  ;;  %v100_v53 = vmul.f32 %v380_v1, %v29_v41  ;;  %v228_v55 = vmax.f32 %v164_v46, 0.0  ;;  %v42_v36 = vld [vmem:[%s896_s0 + $0xe0] sm:$0xff]  ;;  %v43_v37 = vld [vmem:[%s896_s0 + $0xe8] sm:$0xff] }
   0xd   :  { %v168_v56 = vadd.f32 %v385_v2, %v97_v47  ;;  %v169_v57 = vadd.f32 %v385_v2, %v98_v48  ;;  %v170_v58 = vadd.f32 %v385_v2, %v99_v49  ;;  %v229_v62 = vmax.f32 %v165_v50, 0.0  ;;  %v44_v38 = vld [vmem:[%s896_s0 + $0xf0] sm:$0xff]  ;;  %v45_v43 = vld [vmem:[%s896_s0 + $0xf8] sm:$0xff] }
   0xe   :  { %v230_v63 = vmax.f32 %v166_v51, 0.0  ;;  %v231_v0 = vmax.f32 %v167_v52, 0.0  ;;  %v171_v3 = vadd.f32 %v385_v2, %v100_v53  ;;  %292 = vst [vmem:[%s899_s3 + $0x40] sm:$0xff] %v228_v55  ;;  %v101_v10 = vmul.f32 %v380_v1, %v30_v54 }
   0xf   :  { %v232_v7 = vmax.f32 %v168_v56, 0.0  ;;  %v233_v8 = vmax.f32 %v169_v57, 0.0  ;;  %v234_v9 = vmax.f32 %v170_v58, 0.0  ;;  %293 = vst [vmem:[%s899_s3 + $0x48] sm:$0xff] %v229_v62  ;;  %v102_v13 = vmul.f32 %v380_v1, %v31_v59  ;;  %v46_v56 = vld [vmem:[%s896_s0 + $0x100] sm:$0xff]  ;;  %v48_v62 = vld [vmem:[%s896_s0 + $0x110] sm:$0xff] }
  0x10   :  { %294 = vst [vmem:[%s899_s3 + $0x50] sm:$0xff] %v230_v63  ;;  %295 = vst [vmem:[%s899_s3 + $0x58] sm:$0xff] %v231_v0  ;;  %v235_v12 = vmax.f32 %v171_v3, 0.0  ;;  %v103_v14 = vmul.f32 %v380_v1, %v32_v60  ;;  %v104_v15 = vmul.f32 %v380_v1, %v33_v61  ;;  %v172_v16 = vadd.f32 %v385_v2, %v101_v10  ;;  %v47_v61 = vld [vmem:[%s896_s0 + $0x108] sm:$0xff]  ;;  %v49_v63 = vld [vmem:[%s896_s0 + $0x118] sm:$0xff] }
  0x11   :  { %296 = vst [vmem:[%s899_s3 + $0x60] sm:$0xff] %v232_v7  ;;  %297 = vst [vmem:[%s899_s3 + $0x68] sm:$0xff] %v233_v8  ;;  %v105_v17 = vmul.f32 %v380_v1, %v34_v4  ;;  %v106_v18 = vmul.f32 %v380_v1, %v35_v5  ;;  %v107_v19 = vmul.f32 %v380_v1, %v36_v6  ;;  %v50_v6 = vld [vmem:[%s896_s0 + $0x120] sm:$0xff]  ;;  %v51_v7 = vld [vmem:[%s896_s0 + $0x128] sm:$0xff] }
  0x12   :  { %298 = vst [vmem:[%s899_s3 + $0x70] sm:$0xff] %v234_v9  ;;  %299 = vst [vmem:[%s899_s3 + $0x78] sm:$0xff] %v235_v12  ;;  %v173_v20 = vadd.f32 %v385_v2, %v102_v13  ;;  %v174_v21 = vadd.f32 %v385_v2, %v103_v14  ;;  %v175_v22 = vadd.f32 %v385_v2, %v104_v15  ;;  %v236_v25 = vmax.f32 %v172_v16, 0.0  ;;  %v52_v8 = vld [vmem:[%s896_s0 + $0x130] sm:$0xff]  ;;  %v53_v13 = vld [vmem:[%s896_s0 + $0x138] sm:$0xff] }
  0x13   :  { %v108_v23 = vmul.f32 %v380_v1, %v37_v11  ;;  %v176_v26 = vadd.f32 %v385_v2, %v105_v17  ;;  %v177_v27 = vadd.f32 %v385_v2, %v106_v18  ;;  %v178_v28 = vadd.f32 %v385_v2, %v107_v19 }
  0x14   :  { %v237_v32 = vmax.f32 %v173_v20, 0.0  ;;  %v238_v33 = vmax.f32 %v174_v21, 0.0  ;;  %v239_v34 = vmax.f32 %v175_v22, 0.0  ;;  %300 = vst [vmem:[%s899_s3 + $0x80] sm:$0xff] %v236_v25  ;;  %v109_v42 = vmul.f32 %v380_v1, %v38_v24 }
  0x15   :  { %v179_v35 = vadd.f32 %v385_v2, %v108_v23  ;;  %v240_v39 = vmax.f32 %v176_v26, 0.0  ;;  %v241_v40 = vmax.f32 %v177_v27, 0.0  ;;  %v242_v41 = vmax.f32 %v178_v28, 0.0  ;;  %v54_v26 = vld [vmem:[%s896_s0 + $0x140] sm:$0xff] }
  0x16   :  { %301 = vst [vmem:[%s899_s3 + $0x88] sm:$0xff] %v237_v32  ;;  %302 = vst [vmem:[%s899_s3 + $0x90] sm:$0xff] %v238_v33  ;;  %v110_v45 = vmul.f32 %v380_v1, %v39_v29  ;;  %v111_v46 = vmul.f32 %v380_v1, %v40_v30  ;;  %v112_v47 = vmul.f32 %v380_v1, %v41_v31  ;;  %v55_v31 = vld [vmem:[%s896_s0 + $0x148] sm:$0xff]  ;;  %v56_v32 = vld [vmem:[%s896_s0 + $0x150] sm:$0xff] }
  0x17   :  { %303 = vst [vmem:[%s899_s3 + $0x98] sm:$0xff] %v239_v34  ;;  %v243_v44 = vmax.f32 %v179_v35, 0.0  ;;  %304 = vst [vmem:[%s899_s3 + $0xa0] sm:$0xff] %v240_v39  ;;  %v180_v48 = vadd.f32 %v385_v2, %v109_v42  ;;  %v113_v49 = vmul.f32 %v380_v1, %v42_v36  ;;  %v114_v50 = vmul.f32 %v380_v1, %v43_v37  ;;  %v57_v33 = vld [vmem:[%s896_s0 + $0x158] sm:$0xff]  ;;  %v59_v39 = vld [vmem:[%s896_s0 + $0x168] sm:$0xff] }
  0x18   :  { %305 = vst [vmem:[%s899_s3 + $0xa8] sm:$0xff] %v241_v40  ;;  %306 = vst [vmem:[%s899_s3 + $0xb0] sm:$0xff] %v242_v41  ;;  %v115_v51 = vmul.f32 %v380_v1, %v44_v38  ;;  %v181_v52 = vadd.f32 %v385_v2, %v110_v45  ;;  %v182_v53 = vadd.f32 %v385_v2, %v111_v46  ;;  %v58_v38 = vld [vmem:[%s896_s0 + $0x160] sm:$0xff]  ;;  %v60_v40 = vld [vmem:[%s896_s0 + $0x170] sm:$0xff] }
  0x19   :  { %307 = vst [vmem:[%s899_s3 + $0xb8] sm:$0xff] %v243_v44  ;;  %v183_v54 = vadd.f32 %v385_v2, %v112_v47  ;;  %v116_v55 = vmul.f32 %v380_v1, %v45_v43  ;;  %v244_v57 = vmax.f32 %v180_v48, 0.0  ;;  %v184_v58 = vadd.f32 %v385_v2, %v113_v49  ;;  %v61_v45 = vld [vmem:[%s896_s0 + $0x178] sm:$0xff] }
  0x1a   :  { %v185_v59 = vadd.f32 %v385_v2, %v114_v50  ;;  %v186_v60 = vadd.f32 %v385_v2, %v115_v51  ;;  %v245_v0 = vmax.f32 %v181_v52, 0.0  ;;  %v246_v3 = vmax.f32 %v182_v53, 0.0 }
  0x1b   :  { %v247_v4 = vmax.f32 %v183_v54, 0.0  ;;  %v187_v5 = vadd.f32 %v385_v2, %v116_v55  ;;  %308 = vst [vmem:[%s899_s3 + $0xc0] sm:$0xff] %v244_v57  ;;  %v248_v9 = vmax.f32 %v184_v58, 0.0  ;;  %v117_v12 = vmul.f32 %v380_v1, %v46_v56  ;;  %v62_v58 = vld [vmem:[%s896_s0 + $0x180] sm:$0xff] }
  0x1c   :  { %v249_v10 = vmax.f32 %v185_v59, 0.0  ;;  %v250_v11 = vmax.f32 %v186_v60, 0.0  ;;  %309 = vst [vmem:[%s899_s3 + $0xc8] sm:$0xff] %v245_v0  ;;  %310 = vst [vmem:[%s899_s3 + $0xd0] sm:$0xff] %v246_v3  ;;  %v118_v15 = vmul.f32 %v380_v1, %v47_v61  ;;  %v119_v16 = vmul.f32 %v380_v1, %v48_v62  ;;  %v64_v0 = vld [vmem:[%s896_s0 + $0x190] sm:$0xff]  ;;  %v65_v3 = vld [vmem:[%s896_s0 + $0x198] sm:$0xff] }
  0x1d   :  { %311 = vst [vmem:[%s899_s3 + $0xd8] sm:$0xff] %v247_v4  ;;  %v251_v14 = vmax.f32 %v187_v5, 0.0  ;;  %v120_v17 = vmul.f32 %v380_v1, %v49_v63  ;;  %312 = vst [vmem:[%s899_s3 + $0xe0] sm:$0xff] %v248_v9  ;;  %v188_v18 = vadd.f32 %v385_v2, %v117_v12  ;;  %v121_v19 = vmul.f32 %v380_v1, %v50_v6  ;;  %v63_v63 = vld [vmem:[%s896_s0 + $0x188] sm:$0xff] }
  0x1e   :  { %313 = vst [vmem:[%s899_s3 + $0xe8] sm:$0xff] %v249_v10  ;;  %314 = vst [vmem:[%s899_s3 + $0xf0] sm:$0xff] %v250_v11  ;;  %v122_v20 = vmul.f32 %v380_v1, %v51_v7  ;;  %v123_v21 = vmul.f32 %v380_v1, %v52_v8  ;;  %v189_v22 = vadd.f32 %v385_v2, %v118_v15  ;;  %v66_v8 = vld [vmem:[%s896_s0 + $0x1a0] sm:$0xff]  ;;  %v67_v9 = vld [vmem:[%s896_s0 + $0x1a8] sm:$0xff] }
  0x1f   :  { %315 = vst [vmem:[%s899_s3 + $0xf8] sm:$0xff] %v251_v14  ;;  %v190_v23 = vadd.f32 %v385_v2, %v119_v16  ;;  %v191_v24 = vadd.f32 %v385_v2, %v120_v17  ;;  %v124_v25 = vmul.f32 %v380_v1, %v53_v13  ;;  %v252_v27 = vmax.f32 %v188_v18, 0.0  ;;  %v68_v10 = vld [vmem:[%s896_s0 + $0x1b0] sm:$0xff]  ;;  %v69_v15 = vld [vmem:[%s896_s0 + $0x1b8] sm:$0xff] }
  0x20   :  { %v192_v28 = vadd.f32 %v385_v2, %v121_v19  ;;  %v193_v29 = vadd.f32 %v385_v2, %v122_v20  ;;  %v194_v30 = vadd.f32 %v385_v2, %v123_v21  ;;  %v253_v34 = vmax.f32 %v189_v22, 0.0 }
  0x21   :  { %v254_v35 = vmax.f32 %v190_v23, 0.0  ;;  %v255_v36 = vmax.f32 %v191_v24, 0.0  ;;  %v195_v37 = vadd.f32 %v385_v2, %v124_v25  ;;  %316 = vst [vmem:[%s899_s3 + $0x100] sm:$0xff] %v252_v27  ;;  %v125_v44 = vmul.f32 %v380_v1, %v54_v26 }
  0x22   :  { %v256_v41 = vmax.f32 %v192_v28, 0.0  ;;  %v257_v42 = vmax.f32 %v193_v29, 0.0  ;;  %v258_v43 = vmax.f32 %v194_v30, 0.0  ;;  %317 = vst [vmem:[%s899_s3 + $0x108] sm:$0xff] %v253_v34  ;;  %v126_v47 = vmul.f32 %v380_v1, %v55_v31  ;;  %v70_v28 = vld [vmem:[%s896_s0 + $0x1c0] sm:$0xff]  ;;  %v72_v34 = vld [vmem:[%s896_s0 + $0x1d0] sm:$0xff] }
  0x23   :  { %318 = vst [vmem:[%s899_s3 + $0x110] sm:$0xff] %v254_v35  ;;  %319 = vst [vmem:[%s899_s3 + $0x118] sm:$0xff] %v255_v36  ;;  %v259_v46 = vmax.f32 %v195_v37, 0.0  ;;  %v127_v48 = vmul.f32 %v380_v1, %v56_v32  ;;  %v128_v49 = vmul.f32 %v380_v1, %v57_v33  ;;  %v196_v50 = vadd.f32 %v385_v2, %v125_v44  ;;  %v71_v33 = vld [vmem:[%s896_s0 + $0x1c8] sm:$0xff]  ;;  %v73_v35 = vld [vmem:[%s896_s0 + $0x1d8] sm:$0xff] }
  0x24   :  { %320 = vst [vmem:[%s899_s3 + $0x120] sm:$0xff] %v256_v41  ;;  %321 = vst [vmem:[%s899_s3 + $0x128] sm:$0xff] %v257_v42  ;;  %v129_v51 = vmul.f32 %v380_v1, %v58_v38  ;;  %v130_v52 = vmul.f32 %v380_v1, %v59_v39  ;;  %v131_v53 = vmul.f32 %v380_v1, %v60_v40  ;;  %v74_v40 = vld [vmem:[%s896_s0 + $0x1e0] sm:$0xff]  ;;  %v75_v41 = vld [vmem:[%s896_s0 + $0x1e8] sm:$0xff] }
  0x25   :  { %322 = vst [vmem:[%s899_s3 + $0x130] sm:$0xff] %v258_v43  ;;  %323 = vst [vmem:[%s899_s3 + $0x138] sm:$0xff] %v259_v46  ;;  %v197_v54 = vadd.f32 %v385_v2, %v126_v47  ;;  %v198_v55 = vadd.f32 %v385_v2, %v127_v48  ;;  %v199_v56 = vadd.f32 %v385_v2, %v128_v49  ;;  %v260_v59 = vmax.f32 %v196_v50, 0.0  ;;  %v76_v42 = vld [vmem:[%s896_s0 + $0x1f0] sm:$0xff]  ;;  %v77_v47 = vld [vmem:[%s896_s0 + $0x1f8] sm:$0xff] }
  0x26   :  { %v132_v57 = vmul.f32 %v380_v1, %v61_v45  ;;  %v200_v60 = vadd.f32 %v385_v2, %v129_v51  ;;  %v201_v61 = vadd.f32 %v385_v2, %v130_v52  ;;  %v202_v62 = vadd.f32 %v385_v2, %v131_v53 }
  0x27   :  { %v261_v4 = vmax.f32 %v197_v54, 0.0  ;;  %v262_v5 = vmax.f32 %v198_v55, 0.0  ;;  %v263_v6 = vmax.f32 %v199_v56, 0.0  ;;  %324 = vst [vmem:[%s899_s3 + $0x140] sm:$0xff] %v260_v59  ;;  %v133_v14 = vmul.f32 %v380_v1, %v62_v58 }
  0x28   :  { %v203_v7 = vadd.f32 %v385_v2, %v132_v57  ;;  %v264_v11 = vmax.f32 %v200_v60, 0.0  ;;  %v265_v12 = vmax.f32 %v201_v61, 0.0  ;;  %v266_v13 = vmax.f32 %v202_v62, 0.0 }
  0x29   :  { %325 = vst [vmem:[%s899_s3 + $0x148] sm:$0xff] %v261_v4  ;;  %326 = vst [vmem:[%s899_s3 + $0x150] sm:$0xff] %v262_v5  ;;  %v134_v17 = vmul.f32 %v380_v1, %v63_v63  ;;  %v135_v18 = vmul.f32 %v380_v1, %v64_v0  ;;  %v136_v19 = vmul.f32 %v380_v1, %v65_v3 }
  0x2a   :  { %327 = vst [vmem:[%s899_s3 + $0x158] sm:$0xff] %v263_v6  ;;  %v267_v16 = vmax.f32 %v203_v7, 0.0  ;;  %328 = vst [vmem:[%s899_s3 + $0x160] sm:$0xff] %v264_v11  ;;  %v204_v20 = vadd.f32 %v385_v2, %v133_v14  ;;  %v137_v21 = vmul.f32 %v380_v1, %v66_v8  ;;  %v138_v22 = vmul.f32 %v380_v1, %v67_v9 }
  0x2b   :  { %329 = vst [vmem:[%s899_s3 + $0x168] sm:$0xff] %v265_v12  ;;  %330 = vst [vmem:[%s899_s3 + $0x170] sm:$0xff] %v266_v13  ;;  %v139_v23 = vmul.f32 %v380_v1, %v68_v10  ;;  %v205_v24 = vadd.f32 %v385_v2, %v134_v17  ;;  %v206_v25 = vadd.f32 %v385_v2, %v135_v18 }
  0x2c   :  { %331 = vst [vmem:[%s899_s3 + $0x178] sm:$0xff] %v267_v16  ;;  %v207_v26 = vadd.f32 %v385_v2, %v136_v19  ;;  %v140_v27 = vmul.f32 %v380_v1, %v69_v15  ;;  %v268_v29 = vmax.f32 %v204_v20, 0.0  ;;  %v208_v30 = vadd.f32 %v385_v2, %v137_v21 }
  0x2d   :  { %v209_v31 = vadd.f32 %v385_v2, %v138_v22  ;;  %v210_v32 = vadd.f32 %v385_v2, %v139_v23  ;;  %v269_v36 = vmax.f32 %v205_v24, 0.0  ;;  %v270_v37 = vmax.f32 %v206_v25, 0.0 }
  0x2e   :  { %v271_v38 = vmax.f32 %v207_v26, 0.0  ;;  %v211_v39 = vadd.f32 %v385_v2, %v140_v27  ;;  %332 = vst [vmem:[%s899_s3 + $0x180] sm:$0xff] %v268_v29  ;;  %v272_v43 = vmax.f32 %v208_v30, 0.0  ;;  %v141_v46 = vmul.f32 %v380_v1, %v70_v28 }
  0x2f   :  { %v273_v44 = vmax.f32 %v209_v31, 0.0  ;;  %v274_v45 = vmax.f32 %v210_v32, 0.0  ;;  %333 = vst [vmem:[%s899_s3 + $0x188] sm:$0xff] %v269_v36  ;;  %334 = vst [vmem:[%s899_s3 + $0x190] sm:$0xff] %v270_v37  ;;  %v142_v49 = vmul.f32 %v380_v1, %v71_v33  ;;  %v143_v50 = vmul.f32 %v380_v1, %v72_v34 }
  0x30   :  { %335 = vst [vmem:[%s899_s3 + $0x198] sm:$0xff] %v271_v38  ;;  %v275_v48 = vmax.f32 %v211_v39, 0.0  ;;  %v144_v51 = vmul.f32 %v380_v1, %v73_v35  ;;  %336 = vst [vmem:[%s899_s3 + $0x1a0] sm:$0xff] %v272_v43  ;;  %v212_v52 = vadd.f32 %v385_v2, %v141_v46  ;;  %v145_v53 = vmul.f32 %v380_v1, %v74_v40 }
  0x31   :  { %337 = vst [vmem:[%s899_s3 + $0x1a8] sm:$0xff] %v273_v44  ;;  %338 = vst [vmem:[%s899_s3 + $0x1b0] sm:$0xff] %v274_v45  ;;  %v146_v54 = vmul.f32 %v380_v1, %v75_v41  ;;  %v147_v55 = vmul.f32 %v380_v1, %v76_v42  ;;  %v213_v56 = vadd.f32 %v385_v2, %v142_v49 }
  0x32   :  { %339 = vst [vmem:[%s899_s3 + $0x1b8] sm:$0xff] %v275_v48  ;;  %v214_v57 = vadd.f32 %v385_v2, %v143_v50  ;;  %v215_v58 = vadd.f32 %v385_v2, %v144_v51  ;;  %v148_v59 = vmul.f32 %v380_v1, %v77_v47  ;;  %v276_v60 = vmax.f32 %v212_v52, 0.0 }
  0x33   :  { %v216_v61 = vadd.f32 %v385_v2, %v145_v53  ;;  %v217_v62 = vadd.f32 %v385_v2, %v146_v54  ;;  %v218_v63 = vadd.f32 %v385_v2, %v147_v55  ;;  %v277_v0 = vmax.f32 %v213_v56, 0.0 }
  0x34   :  { %v278_v3 = vmax.f32 %v214_v57, 0.0  ;;  %v279_v4 = vmax.f32 %v215_v58, 0.0  ;;  %v219_v5 = vadd.f32 %v385_v2, %v148_v59  ;;  %340 = vst [vmem:[%s899_s3 + $0x1c0] sm:$0xff] %v276_v60 }
  0x35   :  { %v280_v6 = vmax.f32 %v216_v61, 0.0  ;;  %v281_v7 = vmax.f32 %v217_v62, 0.0  ;;  %v282_v8 = vmax.f32 %v218_v63, 0.0  ;;  %341 = vst [vmem:[%s899_s3 + $0x1c8] sm:$0xff] %v277_v0 }
  0x36   :  { %342 = vst [vmem:[%s899_s3 + $0x1d0] sm:$0xff] %v278_v3  ;;  %343 = vst [vmem:[%s899_s3 + $0x1d8] sm:$0xff] %v279_v4  ;;  %v283_v1 = vmax.f32 %v219_v5, 0.0 }
  0x37   :  { %344 = vst [vmem:[%s899_s3 + $0x1e0] sm:$0xff] %v280_v6  ;;  %345 = vst [vmem:[%s899_s3 + $0x1e8] sm:$0xff] %v281_v7 }
  0x38   :  { %346 = vst [vmem:[%s899_s3 + $0x1f0] sm:$0xff] %v282_v8  ;;  %347 = vst [vmem:[%s899_s3 + $0x1f8] sm:$0xff] %v283_v1 }

// kernel: vgg_block.4
= control target key start
LH: loop header
LB: loop body
LE: loop exit
PB: predicated region body
PF: predicated region fallthrough
CT: control target
= control target key end

     0   :  { %vm889_vm0 = vcmask 1040384   ;;  %vm891_vm1 = vcmask 1041408   ;;  %s1645_s1 = inlined_call_operand.vmem [shape: bf16[128,128], index: 1, kind: input, shape index: {}]   ;;  %s1646_s0 = inlined_call_operand.vmem [shape: bf16[512,128], index: 0, kind: input, shape index: {}]   ;;  %s1647_s2 = inlined_call_operand.vmem [shape: f32[512,128], index: 2, kind: output, shape index: {0}]   ;;  %s1648_s3 = inlined_call_operand.vmem [shape: f32[1,8,128], index: 3, kind: output, shape index: {1}]  }
   0x1   :  { %v1078_v0 = vld [vmem:[%s1645_s1 + $0x38] sm:$0xff]   ;;  %v1079_v1 = vld [vmem:[%s1645_s1 + $0x30] sm:$0xff]   ;;  %v1080_v2 = vld [vmem:[%s1645_s1 + $0x28] sm:$0xff]  }
   0x2   :  { %982 = vmatprep.subr.bf16.mxu0 %v1078_v0  ;;  %1062 = vmatprep.subr.bf16.mxu1 %v1078_v0  ;;  %v1081_v3 = vld [vmem:[%s1645_s1 + $0x20] sm:$0xff]   ;;  %v1082_v5 = vld [vmem:[%s1645_s1 + $0x18] sm:$0xff]   ;;  %v1083_v6 = vld [vmem:[%s1645_s1 + $0x10] sm:$0xff]  }
   0x3   :  { %983 = vmatpush3.bf16.msra.mxu0 %v1078_v0  ;;  %1070 = vmatpush3.bf16.msra.mxu1 %v1078_v0  ;;  %v1086_v4 = vld [vmem:[%s1646_s0] sm:$0xff]   ;;  %v1084_v7 = vld [vmem:[%s1645_s1 + $0x8] sm:$0xff]   ;;  %v1088_v11 = vld [vmem:[%s1646_s0 + $0x10] sm:$0xff]  }
   0x4   :  { %984 = vmatprep.subr.bf16.mxu0 %v1079_v1  ;;  %1063 = vmatprep.subr.bf16.mxu1 %v1079_v1  ;;  %v1085_v8 = vld [vmem:[%s1645_s1] sm:$0xff]   ;;  %v1087_v10 = vld [vmem:[%s1646_s0 + $0x8] sm:$0xff]   ;;  %v1104_v13 = vld [vmem:[%s1646_s0 + $0x90] sm:$0xff]  }
   0x5   :  { %998 = vmatprep.mubr.bf16.mxu0 %v1086_v4  ;;  %v1102_v9 = vld [vmem:[%s1646_s0 + $0x80] sm:$0xff]   ;;  %v1103_v12 = vld [vmem:[%s1646_s0 + $0x88] sm:$0xff]   ;;  %v1089_v14 = vld [vmem:[%s1646_s0 + $0x18] sm:$0xff]  }
   0x6   :  { %1030 = vmatprep.mubr.bf16.mxu1 %v1102_v9  ;;  %v1090_v15 = vld [vmem:[%s1646_s0 + $0x20] sm:$0xff]   ;;  %v1105_v16 = vld [vmem:[%s1646_s0 + $0x98] sm:$0xff]   ;;  %v1091_v18 = vld [vmem:[%s1646_s0 + $0x28] sm:$0xff]  }
   0x7   :  { %985 = vmatpush3.bf16.msra.mxu0 %v1079_v1  ;;  %1071 = vmatpush3.bf16.msra.mxu1 %v1079_v1  ;;  %v1106_v17 = vld [vmem:[%s1646_s0 + $0xa0] sm:$0xff]   ;;  %v1107_v19 = vld [vmem:[%s1646_s0 + $0xa8] sm:$0xff]   ;;  %v1092_v20 = vld [vmem:[%s1646_s0 + $0x30] sm:$0xff]  }
   0x8   :  { %986 = vmatprep.subr.bf16.mxu0 %v1080_v2  ;;  %1064 = vmatprep.subr.bf16.mxu1 %v1080_v2  ;;  %v1108_v21 = vld [vmem:[%s1646_s0 + $0xb0] sm:$0xff]   ;;  %v1093_v22 = vld [vmem:[%s1646_s0 + $0x38] sm:$0xff]   ;;  %v1094_v24 = vld [vmem:[%s1646_s0 + $0x40] sm:$0xff]  }
   0x9   :  { %v1109_v23 = vld [vmem:[%s1646_s0 + $0xb8] sm:$0xff]   ;;  %v1110_v25 = vld [vmem:[%s1646_s0 + $0xc0] sm:$0xff]   ;;  %v1095_v26 = vld [vmem:[%s1646_s0 + $0x48] sm:$0xff]  }
   0xa   :  { %v1111_v27 = vld [vmem:[%s1646_s0 + $0xc8] sm:$0xff]   ;;  %v1096_v28 = vld [vmem:[%s1646_s0 + $0x50] sm:$0xff]   ;;  %v1097_v30 = vld [vmem:[%s1646_s0 + $0x58] sm:$0xff]  }
   0xb   :  { %987 = vmatpush3.bf16.msra.mxu0 %v1080_v2  ;;  %1072 = vmatpush3.bf16.msra.mxu1 %v1080_v2  ;;  %v1112_v29 = vld [vmem:[%s1646_s0 + $0xd0] sm:$0xff]   ;;  %v1113_v31 = vld [vmem:[%s1646_s0 + $0xd8] sm:$0xff]   ;;  %v1098_v32 = vld [vmem:[%s1646_s0 + $0x60] sm:$0xff]  }
   0xc   :  { %988 = vmatprep.subr.bf16.mxu0 %v1081_v3  ;;  %1065 = vmatprep.subr.bf16.mxu1 %v1081_v3  ;;  %v1114_v33 = vld [vmem:[%s1646_s0 + $0xe0] sm:$0xff]   ;;  %v1099_v34 = vld [vmem:[%s1646_s0 + $0x68] sm:$0xff]   ;;  %v1100_v36 = vld [vmem:[%s1646_s0 + $0x70] sm:$0xff]  }
   0xd   :  { %v1115_v35 = vld [vmem:[%s1646_s0 + $0xe8] sm:$0xff]   ;;  %v1116_v37 = vld [vmem:[%s1646_s0 + $0xf0] sm:$0xff]   ;;  %v1101_v38 = vld [vmem:[%s1646_s0 + $0x78] sm:$0xff]  }
   0xe   :  { %v1117_v39 = vld [vmem:[%s1646_s0 + $0xf8] sm:$0xff]  }
   0xf   :  { %989 = vmatpush3.bf16.msra.mxu0 %v1081_v3  ;;  %1073 = vmatpush3.bf16.msra.mxu1 %v1081_v3 }
  0x10   :  { %990 = vmatprep.subr.bf16.mxu0 %v1082_v5  ;;  %1066 = vmatprep.subr.bf16.mxu1 %v1082_v5 }
  0x13   :  { %991 = vmatpush3.bf16.msra.mxu0 %v1082_v5  ;;  %1074 = vmatpush3.bf16.msra.mxu1 %v1082_v5 }
  0x14   :  { %992 = vmatprep.subr.bf16.mxu0 %v1083_v6  ;;  %1067 = vmatprep.subr.bf16.mxu1 %v1083_v6 }
  0x17   :  { %993 = vmatpush3.bf16.msra.mxu0 %v1083_v6  ;;  %1075 = vmatpush3.bf16.msra.mxu1 %v1083_v6 }
  0x18   :  { %994 = vmatprep.subr.bf16.mxu0 %v1084_v7  ;;  %1068 = vmatprep.subr.bf16.mxu1 %v1084_v7 }
  0x1b   :  { %995 = vmatpush3.bf16.msra.mxu0 %v1084_v7  ;;  %1076 = vmatpush3.bf16.msra.mxu1 %v1084_v7 }
  0x1c   :  { %996 = vmatprep.subr.bf16.mxu0 %v1085_v8  ;;  %1069 = vmatprep.subr.bf16.mxu1 %v1085_v8 }
  0x1f   :  { %997 = vmatpush3.bf16.msra.mxu0 %v1085_v8  ;;  %1077 = vmatpush3.bf16.msra.mxu1 %v1085_v8 }
  0x22   :  { %999 = vmatmul.mubr.bf16.vlgmr.msra.gmra.mxu0 %v1087_v10  ;;  %1031 = vmatmul.mubr.bf16.vlgmr.msra.gmra.mxu1 %v1103_v12 }
  0x23   :  { %1002 = vmatprep.mubr.bf16.mxu0 %v1088_v11  ;;  %1034 = vmatprep.mubr.bf16.mxu1 %v1104_v13 }
  0x2a   :  { %1003 = vmatmul.mubr.bf16.gmra.mxu0 %v1089_v14  ;;  %1035 = vmatmul.mubr.bf16.gmra.mxu1 %v1105_v16 }
  0x2b   :  { %1006 = vmatprep.mubr.bf16.mxu0 %v1090_v15  ;;  %1038 = vmatprep.mubr.bf16.mxu1 %v1106_v17 }
  0x32   :  { %1007 = vmatmul.mubr.bf16.gmra.mxu0 %v1091_v18  ;;  %1039 = vmatmul.mubr.bf16.gmra.mxu1 %v1107_v19 }
  0x33   :  { %1010 = vmatprep.mubr.bf16.mxu0 %v1092_v20  ;;  %1042 = vmatprep.mubr.bf16.mxu1 %v1108_v21 }
  0x3a   :  { %1011 = vmatmul.mubr.bf16.gmra.mxu0 %v1093_v22  ;;  %1043 = vmatmul.mubr.bf16.gmra.mxu1 %v1109_v23 }
  0x3b   :  { %1014 = vmatprep.mubr.bf16.mxu0 %v1094_v24  ;;  %1046 = vmatprep.mubr.bf16.mxu1 %v1110_v25 }
  0x42   :  { %1015 = vmatmul.mubr.bf16.gmra.mxu0 %v1095_v26  ;;  %1047 = vmatmul.mubr.bf16.gmra.mxu1 %v1111_v27 }
  0x43   :  { %1018 = vmatprep.mubr.bf16.mxu0 %v1096_v28  ;;  %1050 = vmatprep.mubr.bf16.mxu1 %v1112_v29 }
  0x4a   :  { %1019 = vmatmul.mubr.bf16.gmra.mxu0 %v1097_v30  ;;  %1051 = vmatmul.mubr.bf16.gmra.mxu1 %v1113_v31 }
  0x4b   :  { %1022 = vmatprep.mubr.bf16.mxu0 %v1098_v32  ;;  %1054 = vmatprep.mubr.bf16.mxu1 %v1114_v33 }
  0x52   :  { %1023 = vmatmul.mubr.bf16.gmra.mxu0 %v1099_v34  ;;  %1055 = vmatmul.mubr.bf16.gmra.mxu1 %v1115_v35 }
  0x53   :  { %1026 = vmatprep.mubr.bf16.mxu0 %v1100_v36  ;;  %1058 = vmatprep.mubr.bf16.mxu1 %v1116_v37 }
  0x5a   :  { %1027 = vmatmul.mubr.bf16.gmra.mxu0 %v1101_v38  ;;  %1059 = vmatmul.mubr.bf16.gmra.mxu1 %v1117_v39 }
  0xe2   :  { %v1000_v40 = vpop.f32.mrf.mxu0  ;;  %v1258_v41 = vpop.f32.mrf.mxu1 }
  0xe3   :  { %625 = vst [vmem:[%s1647_s2 + $0x10] sm:$0xff] %v1000_v40  ;;  %657 = vst [vmem:[%s1647_s2 + $0x110] sm:$0xff] %v1258_v41  ;;  %v758_v53 = vmul.f32 %v1000_v40, %v1000_v40 }
  0xe4   :  { %v368_v42 = vpop.f32.mrf.mxu0  ;;  %v1267_v43 = vpop.f32.mrf.mxu1 }
  0xe5   :  { %623 = vst [vmem:[%s1647_s2] sm:$0xff] %v368_v42  ;;  %655 = vst [vmem:[%s1647_s2 + $0x100] sm:$0xff] %v1267_v43  ;;  %v756_v48 = vmul.f32 %v368_v42, %v368_v42 }
  0xe6   :  { %v1001_v44 = vpop.f32.mrf.mxu0  ;;  %v1276_v45 = vpop.f32.mrf.mxu1 }
  0xe7   :  { %626 = vst [vmem:[%s1647_s2 + $0x18] sm:$0xff] %v1001_v44  ;;  %658 = vst [vmem:[%s1647_s2 + $0x118] sm:$0xff] %v1276_v45  ;;  %v759_v58 = vmul.f32 %v1001_v44, %v1001_v44 }
  0xe8   :  { %v371_v46 = vpop.f32.mrf.mxu0  ;;  %v1285_v47 = vpop.f32.mrf.mxu1 }
  0xe9   :  { %624 = vst [vmem:[%s1647_s2 + $0x8] sm:$0xff] %v371_v46  ;;  %v687_v49 = vadd.f32 %v371_v46, %v368_v42  ;;  %v757_v50 = vmul.f32 %v371_v46, %v371_v46  ;;  %656 = vst [vmem:[%s1647_s2 + $0x108] sm:$0xff] %v1285_v47 }
  0xea   :  { %v1004_v51 = vpop.f32.mrf.mxu0  ;;  %v1294_v52 = vpop.f32.mrf.mxu1 }
  0xeb   :  { %v688_v54 = vadd.f32 %v1000_v40, %v687_v49  ;;  %v820_v55 = vadd.f32 %v757_v50, %v756_v48  ;;  %629 = vst [vmem:[%s1647_s2 + $0x30] sm:$0xff] %v1004_v51  ;;  %661 = vst [vmem:[%s1647_s2 + $0x130] sm:$0xff] %v1294_v52  ;;  %v762_v9 = vmul.f32 %v1004_v51, %v1004_v51 }
  0xec   :  { %v384_v56 = vpop.f32.mrf.mxu0  ;;  %v1303_v57 = vpop.f32.mrf.mxu1 }
  0xed   :  { %v821_v59 = vadd.f32 %v820_v55, %v758_v53  ;;  %627 = vst [vmem:[%s1647_s2 + $0x20] sm:$0xff] %v384_v56  ;;  %v689_v60 = vadd.f32 %v1001_v44, %v688_v54  ;;  %659 = vst [vmem:[%s1647_s2 + $0x120] sm:$0xff] %v1303_v57  ;;  %v760_v0 = vmul.f32 %v384_v56, %v384_v56 }
  0xee   :  { %v1005_v61 = vpop.f32.mrf.mxu0  ;;  %v1312_v62 = vpop.f32.mrf.mxu1 }
  0xef   :  { %v690_v63 = vadd.f32 %v689_v60, %v384_v56  ;;  %v822_v1 = vadd.f32 %v821_v59, %v759_v58  ;;  %630 = vst [vmem:[%s1647_s2 + $0x38] sm:$0xff] %v1005_v61  ;;  %662 = vst [vmem:[%s1647_s2 + $0x138] sm:$0xff] %v1312_v62  ;;  %v763_v14 = vmul.f32 %v1005_v61, %v1005_v61 }
  0xf0   :  { %v387_v2 = vpop.f32.mrf.mxu0  ;;  %v1321_v3 = vpop.f32.mrf.mxu1 }
  0xf1   :  { %v823_v4 = vadd.f32 %v822_v1, %v760_v0  ;;  %628 = vst [vmem:[%s1647_s2 + $0x28] sm:$0xff] %v387_v2  ;;  %v691_v5 = vadd.f32 %v690_v63, %v387_v2  ;;  %v761_v6 = vmul.f32 %v387_v2, %v387_v2  ;;  %660 = vst [vmem:[%s1647_s2 + $0x128] sm:$0xff] %v1321_v3 }
  0xf2   :  { %v1008_v7 = vpop.f32.mrf.mxu0  ;;  %v1330_v8 = vpop.f32.mrf.mxu1 }
  0xf3   :  { %v692_v10 = vadd.f32 %v1004_v51, %v691_v5  ;;  %v824_v11 = vadd.f32 %v823_v4, %v761_v6  ;;  %633 = vst [vmem:[%s1647_s2 + $0x50] sm:$0xff] %v1008_v7  ;;  %665 = vst [vmem:[%s1647_s2 + $0x150] sm:$0xff] %v1330_v8  ;;  %v766_v29 = vmul.f32 %v1008_v7, %v1008_v7 }
  0xf4   :  { %v400_v12 = vpop.f32.mrf.mxu0  ;;  %v1339_v13 = vpop.f32.mrf.mxu1 }
  0xf5   :  { %v825_v15 = vadd.f32 %v824_v11, %v762_v9  ;;  %631 = vst [vmem:[%s1647_s2 + $0x40] sm:$0xff] %v400_v12  ;;  %v693_v16 = vadd.f32 %v1005_v61, %v692_v10  ;;  %663 = vst [vmem:[%s1647_s2 + $0x140] sm:$0xff] %v1339_v13  ;;  %v764_v20 = vmul.f32 %v400_v12, %v400_v12 }
  0xf6   :  { %v1009_v17 = vpop.f32.mrf.mxu0  ;;  %v1348_v18 = vpop.f32.mrf.mxu1 }
  0xf7   :  { %v694_v19 = vadd.f32 %v693_v16, %v400_v12  ;;  %v826_v21 = vadd.f32 %v825_v15, %v763_v14  ;;  %634 = vst [vmem:[%s1647_s2 + $0x58] sm:$0xff] %v1009_v17  ;;  %666 = vst [vmem:[%s1647_s2 + $0x158] sm:$0xff] %v1348_v18  ;;  %v767_v34 = vmul.f32 %v1009_v17, %v1009_v17 }
  0xf8   :  { %v403_v22 = vpop.f32.mrf.mxu0  ;;  %v1357_v23 = vpop.f32.mrf.mxu1 }
  0xf9   :  { %v827_v24 = vadd.f32 %v826_v21, %v764_v20  ;;  %632 = vst [vmem:[%s1647_s2 + $0x48] sm:$0xff] %v403_v22  ;;  %v695_v25 = vadd.f32 %v694_v19, %v403_v22  ;;  %v765_v26 = vmul.f32 %v403_v22, %v403_v22  ;;  %664 = vst [vmem:[%s1647_s2 + $0x148] sm:$0xff] %v1357_v23 }
  0xfa   :  { %v1012_v27 = vpop.f32.mrf.mxu0  ;;  %v1366_v28 = vpop.f32.mrf.mxu1 }
  0xfb   :  { %v696_v30 = vadd.f32 %v1008_v7, %v695_v25  ;;  %v828_v31 = vadd.f32 %v827_v24, %v765_v26  ;;  %637 = vst [vmem:[%s1647_s2 + $0x70] sm:$0xff] %v1012_v27  ;;  %669 = vst [vmem:[%s1647_s2 + $0x170] sm:$0xff] %v1366_v28  ;;  %v770_v54 = vmul.f32 %v1012_v27, %v1012_v27 }
  0xfc   :  { %v416_v32 = vpop.f32.mrf.mxu0  ;;  %v1375_v33 = vpop.f32.mrf.mxu1 }
  0xfd   :  { %v829_v35 = vadd.f32 %v828_v31, %v766_v29  ;;  %635 = vst [vmem:[%s1647_s2 + $0x60] sm:$0xff] %v416_v32  ;;  %v697_v36 = vadd.f32 %v1009_v17, %v696_v30  ;;  %667 = vst [vmem:[%s1647_s2 + $0x160] sm:$0xff] %v1375_v33  ;;  %v768_v40 = vmul.f32 %v416_v32, %v416_v32 }
  0xfe   :  { %v1013_v37 = vpop.f32.mrf.mxu0  ;;  %v1384_v38 = vpop.f32.mrf.mxu1 }
  0xff   :  { %v698_v39 = vadd.f32 %v697_v36, %v416_v32  ;;  %v830_v42 = vadd.f32 %v829_v35, %v767_v34  ;;  %638 = vst [vmem:[%s1647_s2 + $0x78] sm:$0xff] %v1013_v37  ;;  %670 = vst [vmem:[%s1647_s2 + $0x178] sm:$0xff] %v1384_v38  ;;  %v771_v60 = vmul.f32 %v1013_v37, %v1013_v37 }
 0x100   :  { %v419_v44 = vpop.f32.mrf.mxu0  ;;  %v1393_v46 = vpop.f32.mrf.mxu1 }
 0x101   :  { %v831_v48 = vadd.f32 %v830_v42, %v768_v40  ;;  %636 = vst [vmem:[%s1647_s2 + $0x68] sm:$0xff] %v419_v44  ;;  %v699_v49 = vadd.f32 %v698_v39, %v419_v44  ;;  %v769_v50 = vmul.f32 %v419_v44, %v419_v44  ;;  %668 = vst [vmem:[%s1647_s2 + $0x168] sm:$0xff] %v1393_v46 }
 0x102   :  { %v1016_v51 = vpop.f32.mrf.mxu0  ;;  %v1402_v53 = vpop.f32.mrf.mxu1 }
 0x103   :  { %v700_v55 = vadd.f32 %v1012_v27, %v699_v49  ;;  %v832_v56 = vadd.f32 %v831_v48, %v769_v50  ;;  %641 = vst [vmem:[%s1647_s2 + $0x90] sm:$0xff] %v1016_v51  ;;  %673 = vst [vmem:[%s1647_s2 + $0x190] sm:$0xff] %v1402_v53  ;;  %v774_v15 = vmul.f32 %v1016_v51, %v1016_v51 }
 0x104   :  { %v432_v58 = vpop.f32.mrf.mxu0  ;;  %v1411_v59 = vpop.f32.mrf.mxu1 }
 0x105   :  { %v833_v61 = vadd.f32 %v832_v56, %v770_v54  ;;  %639 = vst [vmem:[%s1647_s2 + $0x80] sm:$0xff] %v432_v58  ;;  %v701_v63 = vadd.f32 %v1013_v37, %v700_v55  ;;  %671 = vst [vmem:[%s1647_s2 + $0x180] sm:$0xff] %v1411_v59  ;;  %v772_v4 = vmul.f32 %v432_v58, %v432_v58 }
 0x106   :  { %v1017_v0 = vpop.f32.mrf.mxu0  ;;  %v1420_v1 = vpop.f32.mrf.mxu1 }
 0x107   :  { %v702_v2 = vadd.f32 %v701_v63, %v432_v58  ;;  %v834_v5 = vadd.f32 %v833_v61, %v771_v60  ;;  %642 = vst [vmem:[%s1647_s2 + $0x98] sm:$0xff] %v1017_v0  ;;  %674 = vst [vmem:[%s1647_s2 + $0x198] sm:$0xff] %v1420_v1  ;;  %v775_v21 = vmul.f32 %v1017_v0, %v1017_v0 }
 0x108   :  { %v435_v6 = vpop.f32.mrf.mxu0  ;;  %v1429_v7 = vpop.f32.mrf.mxu1 }
 0x109   :  { %v835_v9 = vadd.f32 %v834_v5, %v772_v4  ;;  %640 = vst [vmem:[%s1647_s2 + $0x88] sm:$0xff] %v435_v6  ;;  %v703_v10 = vadd.f32 %v702_v2, %v435_v6  ;;  %v773_v11 = vmul.f32 %v435_v6, %v435_v6  ;;  %672 = vst [vmem:[%s1647_s2 + $0x188] sm:$0xff] %v1429_v7 }
 0x10a   :  { %v1020_v12 = vpop.f32.mrf.mxu0  ;;  %v1438_v14 = vpop.f32.mrf.mxu1 }
 0x10b   :  { %v704_v16 = vadd.f32 %v1016_v51, %v703_v10  ;;  %v836_v17 = vadd.f32 %v835_v9, %v773_v11  ;;  %645 = vst [vmem:[%s1647_s2 + $0xb0] sm:$0xff] %v1020_v12  ;;  %677 = vst [vmem:[%s1647_s2 + $0x1b0] sm:$0xff] %v1438_v14  ;;  %v778_v40 = vmul.f32 %v1020_v12, %v1020_v12 }
 0x10c   :  { %v448_v19 = vpop.f32.mrf.mxu0  ;;  %v1447_v20 = vpop.f32.mrf.mxu1 }
 0x10d   :  { %v837_v22 = vadd.f32 %v836_v17, %v774_v15  ;;  %643 = vst [vmem:[%s1647_s2 + $0xa0] sm:$0xff] %v448_v19  ;;  %v705_v24 = vadd.f32 %v1017_v0, %v704_v16  ;;  %675 = vst [vmem:[%s1647_s2 + $0x1a0] sm:$0xff] %v1447_v20  ;;  %v776_v29 = vmul.f32 %v448_v19, %v448_v19 }
 0x10e   :  { %v1021_v25 = vpop.f32.mrf.mxu0  ;;  %v1456_v26 = vpop.f32.mrf.mxu1 }
 0x10f   :  { %v706_v27 = vadd.f32 %v705_v24, %v448_v19  ;;  %v838_v30 = vadd.f32 %v837_v22, %v775_v21  ;;  %646 = vst [vmem:[%s1647_s2 + $0xb8] sm:$0xff] %v1021_v25  ;;  %678 = vst [vmem:[%s1647_s2 + $0x1b8] sm:$0xff] %v1456_v26  ;;  %v779_v50 = vmul.f32 %v1021_v25, %v1021_v25 }
 0x110   :  { %v451_v31 = vpop.f32.mrf.mxu0  ;;  %v1465_v32 = vpop.f32.mrf.mxu1 }
 0x111   :  { %v839_v34 = vadd.f32 %v838_v30, %v776_v29  ;;  %644 = vst [vmem:[%s1647_s2 + $0xa8] sm:$0xff] %v451_v31  ;;  %v707_v35 = vadd.f32 %v706_v27, %v451_v31  ;;  %v777_v36 = vmul.f32 %v451_v31, %v451_v31  ;;  %676 = vst [vmem:[%s1647_s2 + $0x1a8] sm:$0xff] %v1465_v32 }
 0x112   :  { %v1024_v37 = vpop.f32.mrf.mxu0  ;;  %v1474_v39 = vpop.f32.mrf.mxu1 }
 0x113   :  { %v708_v42 = vadd.f32 %v1020_v12, %v707_v35  ;;  %v840_v44 = vadd.f32 %v839_v34, %v777_v36  ;;  %649 = vst [vmem:[%s1647_s2 + $0xd0] sm:$0xff] %v1024_v37  ;;  %681 = vst [vmem:[%s1647_s2 + $0x1d0] sm:$0xff] %v1474_v39  ;;  %v782_v10 = vmul.f32 %v1024_v37, %v1024_v37 }
 0x114   :  { %v464_v48 = vpop.f32.mrf.mxu0  ;;  %v1483_v49 = vpop.f32.mrf.mxu1 }
 0x115   :  { %v841_v51 = vadd.f32 %v840_v44, %v778_v40  ;;  %647 = vst [vmem:[%s1647_s2 + $0xc0] sm:$0xff] %v464_v48  ;;  %v709_v54 = vadd.f32 %v1021_v25, %v708_v42  ;;  %679 = vst [vmem:[%s1647_s2 + $0x1c0] sm:$0xff] %v1483_v49  ;;  %v780_v60 = vmul.f32 %v464_v48, %v464_v48 }
 0x116   :  { %v1025_v55 = vpop.f32.mrf.mxu0  ;;  %v1492_v56 = vpop.f32.mrf.mxu1 }
 0x117   :  { %v710_v58 = vadd.f32 %v709_v54, %v464_v48  ;;  %v842_v61 = vadd.f32 %v841_v51, %v779_v50  ;;  %650 = vst [vmem:[%s1647_s2 + $0xd8] sm:$0xff] %v1025_v55  ;;  %682 = vst [vmem:[%s1647_s2 + $0x1d8] sm:$0xff] %v1492_v56  ;;  %v783_v17 = vmul.f32 %v1025_v55, %v1025_v55 }
 0x118   :  { %v467_v63 = vpop.f32.mrf.mxu0  ;;  %v1501_v0 = vpop.f32.mrf.mxu1  ;;  %v788_v51 = vmul.f32 %v1267_v43, %v1267_v43 }
 0x119   :  { %v843_v2 = vadd.f32 %v842_v61, %v780_v60  ;;  %648 = vst [vmem:[%s1647_s2 + $0xc8] sm:$0xff] %v467_v63  ;;  %v711_v4 = vadd.f32 %v710_v58, %v467_v63  ;;  %v781_v5 = vmul.f32 %v467_v63, %v467_v63  ;;  %680 = vst [vmem:[%s1647_s2 + $0x1c8] sm:$0xff] %v1501_v0 }
 0x11a   :  { %v1028_v6 = vpop.f32.mrf.mxu0  ;;  %v1510_v9 = vpop.f32.mrf.mxu1  ;;  %v789_v60 = vmul.f32 %v1285_v47, %v1285_v47  ;;  %v790_v63 = vmul.f32 %v1258_v41, %v1258_v41 }
 0x11b   :  { %v712_v11 = vadd.f32 %v1024_v37, %v711_v4  ;;  %v844_v12 = vadd.f32 %v843_v2, %v781_v5  ;;  %653 = vst [vmem:[%s1647_s2 + $0xf0] sm:$0xff] %v1028_v6  ;;  %685 = vst [vmem:[%s1647_s2 + $0x1f0] sm:$0xff] %v1510_v9  ;;  %v786_v37 = vmul.f32 %v1028_v6, %v1028_v6 }
 0x11c   :  { %v480_v15 = vpop.f32.mrf.mxu0  ;;  %v1519_v16 = vpop.f32.mrf.mxu1  ;;  %v791_v5 = vmul.f32 %v1276_v45, %v1276_v45 }
 0x11d   :  { %v845_v19 = vadd.f32 %v844_v12, %v782_v10  ;;  %651 = vst [vmem:[%s1647_s2 + $0xe0] sm:$0xff] %v480_v15  ;;  %v713_v21 = vadd.f32 %v1025_v55, %v712_v11  ;;  %683 = vst [vmem:[%s1647_s2 + $0x1e0] sm:$0xff] %v1519_v16  ;;  %v784_v27 = vmul.f32 %v480_v15, %v480_v15 }
 0x11e   :  { %v1029_v22 = vpop.f32.mrf.mxu0  ;;  %v1528_v24 = vpop.f32.mrf.mxu1  ;;  %v792_v11 = vmul.f32 %v1303_v57, %v1303_v57 }
 0x11f   :  { %v714_v25 = vadd.f32 %v713_v21, %v480_v15  ;;  %v846_v29 = vadd.f32 %v845_v19, %v783_v17  ;;  %654 = vst [vmem:[%s1647_s2 + $0xf8] sm:$0xff] %v1029_v22  ;;  %686 = vst [vmem:[%s1647_s2 + $0x1f8] sm:$0xff] %v1528_v24  ;;  %v787_v44 = vmul.f32 %v1029_v22, %v1029_v22 }
 0x120   :  { %v483_v30 = vpop.f32.mrf.mxu0  ;;  %v1537_v31 = vpop.f32.mrf.mxu1  ;;  %v793_v17 = vmul.f32 %v1321_v3, %v1321_v3 }
 0x121   :  { %v847_v34 = vadd.f32 %v846_v29, %v784_v27  ;;  %652 = vst [vmem:[%s1647_s2 + $0xe8] sm:$0xff] %v483_v30  ;;  %v715_v35 = vadd.f32 %v714_v25, %v483_v30  ;;  %v785_v36 = vmul.f32 %v483_v30, %v483_v30  ;;  %684 = vst [vmem:[%s1647_s2 + $0x1e8] sm:$0xff] %v1537_v31 }
 0x122   :  { %v796_v27 = vmul.f32 %v1339_v13, %v1339_v13 }
 0x123   :  { %v716_v40 = vadd.f32 %v1028_v6, %v715_v35  ;;  %v848_v42 = vadd.f32 %v847_v34, %v785_v36  ;;  %v797_v34 = vmul.f32 %v1357_v23, %v1357_v23 }
 0x125   :  { %v717_v48 = vadd.f32 %v1029_v22, %v716_v40  ;;  %v849_v50 = vadd.f32 %v848_v42, %v786_v37  ;;  %v800_v42 = vmul.f32 %v1375_v33, %v1375_v33 }
 0x127   :  { %v850_v54 = vadd.f32 %v849_v50, %v787_v44  ;;  %v718_v55 = vadd.f32 %v717_v48, %v1267_v43  ;;  %v801_v50 = vmul.f32 %v1393_v46, %v1393_v46 }
 0x129   :  { %v719_v58 = vadd.f32 %v718_v55, %v1285_v47  ;;  %v851_v61 = vadd.f32 %v850_v54, %v788_v51 }
 0x12b   :  { %v720_v2 = vadd.f32 %v1258_v41, %v719_v58  ;;  %v852_v4 = vadd.f32 %v851_v61, %v789_v60  ;;  %v794_v41 = vmul.f32 %v1294_v52, %v1294_v52  ;;  %v804_v60 = vmul.f32 %v1411_v59, %v1411_v59 }
 0x12d   :  { %v853_v6 = vadd.f32 %v852_v4, %v790_v63  ;;  %v721_v10 = vadd.f32 %v1276_v45, %v720_v2  ;;  %v795_v45 = vmul.f32 %v1312_v62, %v1312_v62  ;;  %v805_v2 = vmul.f32 %v1429_v7, %v1429_v7 }
 0x12f   :  { %v722_v43 = vadd.f32 %v721_v10, %v1303_v57  ;;  %v854_v12 = vadd.f32 %v853_v6, %v791_v5 }
 0x131   :  { %v855_v47 = vadd.f32 %v854_v12, %v792_v11  ;;  %v723_v15 = vadd.f32 %v722_v43, %v1321_v3  ;;  %v808_v43 = vmul.f32 %v1447_v20, %v1447_v20 }
 0x133   :  { %v724_v19 = vadd.f32 %v1294_v52, %v723_v15  ;;  %v856_v21 = vadd.f32 %v855_v47, %v793_v17  ;;  %v798_v52 = vmul.f32 %v1330_v8, %v1330_v8  ;;  %v809_v47 = vmul.f32 %v1465_v32, %v1465_v32 }
 0x135   :  { %v857_v22 = vadd.f32 %v856_v21, %v794_v41  ;;  %v725_v25 = vadd.f32 %v1312_v62, %v724_v19  ;;  %v799_v62 = vmul.f32 %v1348_v18, %v1348_v18  ;;  %v812_v21 = vmul.f32 %v1483_v49, %v1483_v49 }
 0x137   :  { %v726_v57 = vadd.f32 %v725_v25, %v1339_v13  ;;  %v858_v29 = vadd.f32 %v857_v22, %v795_v45  ;;  %v813_v25 = vmul.f32 %v1501_v0, %v1501_v0 }
 0x139   :  { %v859_v30 = vadd.f32 %v858_v29, %v796_v27  ;;  %v727_v3 = vadd.f32 %v726_v57, %v1357_v23 }
 0x13b   :  { %v728_v35 = vadd.f32 %v1330_v8, %v727_v3  ;;  %v860_v36 = vadd.f32 %v859_v30, %v797_v34  ;;  %v802_v8 = vmul.f32 %v1366_v28, %v1366_v28  ;;  %v816_v3 = vmul.f32 %v1519_v16, %v1519_v16 }
 0x13d   :  { %v861_v37 = vadd.f32 %v860_v36, %v798_v52  ;;  %v729_v40 = vadd.f32 %v1348_v18, %v728_v35  ;;  %v803_v18 = vmul.f32 %v1384_v38, %v1384_v38  ;;  %v817_v35 = vmul.f32 %v1537_v31, %v1537_v31 }
 0x13f   :  { %v730_v13 = vadd.f32 %v729_v40, %v1375_v33  ;;  %v862_v44 = vadd.f32 %v861_v37, %v799_v62 }
 0x141   :  { %v863_v48 = vadd.f32 %v862_v44, %v800_v42  ;;  %v731_v23 = vadd.f32 %v730_v13, %v1393_v46 }
 0x143   :  { %v732_v51 = vadd.f32 %v1366_v28, %v731_v23  ;;  %v864_v54 = vadd.f32 %v863_v48, %v801_v50  ;;  %v806_v28 = vmul.f32 %v1402_v53, %v1402_v53 }
 0x145   :  { %v865_v55 = vadd.f32 %v864_v54, %v802_v8  ;;  %v733_v58 = vadd.f32 %v1384_v38, %v732_v51  ;;  %v807_v38 = vmul.f32 %v1420_v1, %v1420_v1 }
 0x147   :  { %v734_v33 = vadd.f32 %v733_v58, %v1411_v59  ;;  %v866_v61 = vadd.f32 %v865_v55, %v803_v18 }
 0x149   :  { %v867_v63 = vadd.f32 %v866_v61, %v804_v60  ;;  %v735_v46 = vadd.f32 %v734_v33, %v1429_v7 }
 0x14b   :  { %v736_v4 = vadd.f32 %v1402_v53, %v735_v46  ;;  %v868_v5 = vadd.f32 %v867_v63, %v805_v2  ;;  %v810_v53 = vmul.f32 %v1438_v14, %v1438_v14 }
 0x14d   :  { %v869_v6 = vadd.f32 %v868_v5, %v806_v28  ;;  %v737_v10 = vadd.f32 %v1420_v1, %v736_v4  ;;  %v811_v1 = vmul.f32 %v1456_v26, %v1456_v26 }
 0x14f   :  { %v738_v59 = vadd.f32 %v737_v10, %v1447_v20  ;;  %v870_v11 = vadd.f32 %v869_v6, %v807_v38 }
 0x151   :  { %v871_v12 = vadd.f32 %v870_v11, %v808_v43  ;;  %v739_v7 = vadd.f32 %v738_v59, %v1465_v32 }
 0x153   :  { %v740_v15 = vadd.f32 %v1438_v14, %v739_v7  ;;  %v872_v17 = vadd.f32 %v871_v12, %v809_v47  ;;  %v814_v14 = vmul.f32 %v1474_v39, %v1474_v39 }
 0x155   :  { %v873_v41 = vadd.f32 %v872_v17, %v810_v53  ;;  %v741_v19 = vadd.f32 %v1456_v26, %v740_v15  ;;  %v815_v26 = vmul.f32 %v1492_v56, %v1492_v56 }
 0x157   :  { %v742_v20 = vadd.f32 %v741_v19, %v1483_v49  ;;  %v874_v45 = vadd.f32 %v873_v41, %v811_v1 }
 0x159   :  { %v875_v22 = vadd.f32 %v874_v45, %v812_v21  ;;  %v743_v32 = vadd.f32 %v742_v20, %v1501_v0 }
 0x15b   :  { %v744_v57 = vadd.f32 %v1474_v39, %v743_v32  ;;  %v876_v27 = vadd.f32 %v875_v22, %v813_v25  ;;  %v818_v39 = vmul.f32 %v1510_v9, %v1510_v9 }
 0x15d   :  { %v877_v29 = vadd.f32 %v876_v27, %v814_v14  ;;  %v745_v30 = vadd.f32 %v1492_v56, %v744_v57  ;;  %v819_v56 = vmul.f32 %v1528_v24, %v1528_v24 }
 0x15f   :  { %v746_v49 = vadd.f32 %v745_v30, %v1519_v16  ;;  %v878_v34 = vadd.f32 %v877_v29, %v815_v26 }
 0x161   :  { %v879_v52 = vadd.f32 %v878_v34, %v816_v3  ;;  %v747_v0 = vadd.f32 %v746_v49, %v1537_v31 }
 0x163   :  { %v748_v36 = vadd.f32 %v1510_v9, %v747_v0  ;;  %v880_v62 = vadd.f32 %v879_v52, %v817_v35 }
 0x165   :  { %v749_v37 = vadd.f32 %v1528_v24, %v748_v36  ;;  %v881_v40 = vadd.f32 %v880_v62, %v818_v39 }
 0x167   :  { %v750_v16 = vrot.slane %v749_v37, 4  ;;  %v882_v13 = vadd.f32 %v881_v40, %v819_v56 }
 0x169   :  { %v751_v42 = vadd.f32 %v750_v16, %v749_v37  ;;  %v883_v44 = vrot.slane %v882_v13, 4 }
 0x16b   :  { %v752_v48 = vrot.slane %v751_v42, 2  ;;  %v884_v23 = vadd.f32 %v883_v44, %v882_v13 }
 0x16d   :  { %v753_v50 = vadd.f32 %v752_v48, %v751_v42  ;;  %v885_v31 = vrot.slane %v884_v23, 2 }
 0x16f   :  { %v754_v8 = vrot.slane %v753_v50, 1  ;;  %v886_v51 = vadd.f32 %v885_v31, %v884_v23 }
 0x171   :  { %v887_v54 = vrot.slane %v886_v51, 1  ;;  %v755_v9 = vadd.f32 %v754_v8, %v753_v50 }
 0x173   :  { %v888_v18 = vadd.f32 %v887_v54, %v886_v51 }
 0x175   :  { %v890_v55 = vsel %vm889_vm0, %v755_v9, %v888_v18 }
 0x176   :  { %v892_v58 = vsel %vm891_vm1, %v890_v55, 0.0 }
 0x177   :  { %893 = vst [vmem:[%s1648_s3] sm:$0xff] %v892_v58 }

</bundles_post_ra>
